<compile_context>
chip_gen: v7x
topology: tpu7x:2x2x1
jax: 0.10.0
libtpu: 0.0.40
codegen_flags: <defaults>
</compile_context>

<pallas_src>
import jax
import jax.numpy as jnp
from jax.experimental import pallas as pl
from jax.experimental.pallas import tpu as pltpu

NINPUT = 32          # stand-in for Npoints_curves_input
HIDDEN1 = 9
HIDDEN2 = 3
NOUTPUT = 1

MAX_TILE_B = 32768           # 32768*32*4 B = 4 MiB x-block; ~18-20 MiB VMEM/step
VMEM_LIMIT_BYTES = 48 << 20  # explicit: > v5e 16 MiB scoped default, < v7x 64 MiB


def _mlp_kernel(x_ref, w1_ref, b1_ref, w2_ref, b2_ref, w3_ref, b3_ref, o_ref):
    # x_ref: (tile_b, NINPUT) in native layout. tanh (elementwise, layout
    # agnostic) first, then transpose the block so the batch dimension sits on
    # the 128-wide lane axis for every matmul and the (1, tile_b) output block
    # is lane-dense (unmasked vst).
    a0 = jnp.tanh(x_ref[...])                                       # act(shift)
    h1 = jnp.tanh(
        jnp.dot(w1_ref[...], a0.T, preferred_element_type=jnp.float32)
        + b1_ref[...]
    )                                                               # (H1, tile_b) f32
    h2 = jnp.tanh(
        jnp.dot(w2_ref[...], h1.astype(w2_ref.dtype),
                preferred_element_type=jnp.float32)
        + b2_ref[...]
    )                                                               # (H2, tile_b) f32
    # Final 1x3 layer on the VPU: an MXU pass here would waste 127/255 result
    # rows and only buy latency / result-FIFO pops.
    w3 = w3_ref[...].astype(jnp.float32)                            # (1, 3)
    out = (w3[0:1, 0:1] * h2[0:1, :]
           + w3[0:1, 1:2] * h2[1:2, :]
           + w3[0:1, 2:3] * h2[2:3, :]
           + b3_ref[...])
    o_ref[...] = out.astype(o_ref.dtype)                            # (1, tile_b) lane-dense


def _choose_tile_b(B):
    """Multiple of 128 that divides B, capped at MAX_TILE_B, preferring >= 4
    grid steps so v7x's two TensorCores both get work and DMA overlaps."""
    if B % 128 != 0 or B <= 128:
        return B                              # tiny/odd batch: single full block
    tile = min(MAX_TILE_B, (B // 4 // 128) * 128)
    tile = max(tile, 128)
    while tile > 128 and B % tile != 0:
        tile -= 128
    if B % tile != 0:
        tile = B
    return tile


def nn_class_forward(x, params, *, tile_b=None):
    """x: [B, NINPUT] (PyTorch layout, f32 or bf16). Returns [B, NOUTPUT]."""
    B, nin = x.shape
    assert nin == NINPUT
    if tile_b is None:
        tile_b = _choose_tile_b(B)
    assert B % tile_b == 0, "B must be divisible by tile_b"
    assert tile_b % 128 == 0 or tile_b == B, "tile_b must be a multiple of 128"

    dt = x.dtype
    # Weights follow the compute dtype (MXU inputs); biases stay f32 so they
    # add into the f32 matmul accumulators at full precision. All tiny.
    w1 = params["w1"].astype(dt)
    w2 = params["w2"].astype(dt)
    w3 = params["w3"].astype(dt)
    b1 = params["b1"].astype(jnp.float32)
    b2 = params["b2"].astype(jnp.float32)
    b3 = params["b3"].astype(jnp.float32)

    grid = (B // tile_b,)
    rep = lambda arr: pl.BlockSpec(arr.shape, lambda i: (0, 0))  # resident params

    itemsize = jnp.dtype(dt).itemsize
    param_bytes = sum(int(a.size) * a.dtype.itemsize
                      for a in (w1, b1, w2, b2, w3, b3))
    cost = pl.CostEstimate(
        flops=2 * B * (NINPUT * HIDDEN1 + HIDDEN1 * HIDDEN2 + HIDDEN2 * NOUTPUT),
        transcendentals=B * (NINPUT + HIDDEN1 + HIDDEN2),
        bytes_accessed=B * (NINPUT + NOUTPUT) * itemsize + param_bytes,
    )

    out_t = pl.pallas_call(
        _mlp_kernel,
        out_shape=jax.ShapeDtypeStruct((NOUTPUT, B), dt),
        grid_spec=pltpu.PrefetchScalarGridSpec(
            num_scalar_prefetch=0,
            grid=grid,
            in_specs=[
                # x in native (B, NINPUT) layout -> no wrapper-side transpose copy.
                pl.BlockSpec((tile_b, NINPUT), lambda i: (i, 0)),
                rep(w1), rep(b1),
                rep(w2), rep(b2),
                rep(w3), rep(b3),
            ],
            out_specs=pl.BlockSpec((NOUTPUT, tile_b), lambda i: (0, i)),
        ),
        compiler_params=pltpu.CompilerParams(
            dimension_semantics=("parallel",),
            vmem_limit_bytes=VMEM_LIMIT_BYTES,
        ),
        cost_estimate=cost,
    )(x, w1, b1, w2, b2, w3, b3)

    # (1, B) -> (B, 1): pure reshape (same memory order), no transpose cost.
    return out_t.reshape(B, NOUTPUT)


def init_params(key):
    """Deterministic init, PyTorch-style shapes (out_features, in_features).
    Biases kept as (out_features, 1) so they broadcast along the lane axis."""
    ks = jax.random.split(key, 6)

    def uniform(k, shape, fan_in):
        bound = 1.0 / jnp.sqrt(fan_in)
        return jax.random.uniform(k, shape, jnp.float32, -bound, bound)

    return {
        "w1": uniform(ks[0], (HIDDEN1, NINPUT), NINPUT),
        "b1": uniform(ks[1], (HIDDEN1, 1), NINPUT),
        "w2": uniform(ks[2], (HIDDEN2, HIDDEN1), HIDDEN1),
        "b2": uniform(ks[3], (HIDDEN2, 1), HIDDEN1),
        "w3": uniform(ks[4], (NOUTPUT, HIDDEN2), HIDDEN2),
        "b3": uniform(ks[5], (NOUTPUT, 1), HIDDEN2),
    }


def reference_forward(x, p):
    h = jnp.tanh(x)
    h = jnp.tanh(h @ p["w1"].T + p["b1"].reshape(-1))
    h = jnp.tanh(h @ p["w2"].T + p["b2"].reshape(-1))
    return h @ p["w3"].T + p["b3"].reshape(-1)


if __name__ == "__main__":
    key = jax.random.PRNGKey(0)
    k_x, k_p = jax.random.split(key)

    B = 1024  # demo batch; default tiling -> tile_b=256, grid=(4,)

    x = jax.random.normal(k_x, (B, NINPUT), jnp.float32)
    params = init_params(k_p)

    out = nn_class_forward(x, params)
    out = jax.block_until_ready(out)

    ref = reference_forward(x, params)
    assert out.shape == (B, NOUTPUT)
    # NOTE: if a bf16-x path is used on v6e/v7x, loosen this tolerance.
    assert jnp.allclose(out, ref, atol=1e-4, rtol=1e-4), "mismatch vs reference"

    print("KERNEL_OK")
</pallas_src>

<mosaic_0001>
module attributes {stable_mosaic.version = 11 : i64} {
  func.func @_mlp_kernel(%arg0: i32, %arg1: memref<256x32xf32, #tpu.memory_space<vmem>>, %arg2: memref<9x32xf32, #tpu.memory_space<vmem>>, %arg3: memref<9x1xf32, #tpu.memory_space<vmem>>, %arg4: memref<3x9xf32, #tpu.memory_space<vmem>>, %arg5: memref<3x1xf32, #tpu.memory_space<vmem>>, %arg6: memref<1x3xf32, #tpu.memory_space<vmem>>, %arg7: memref<1x1xf32, #tpu.memory_space<vmem>>, %arg8: memref<1x256xf32, #tpu.memory_space<vmem>>) attributes {dimension_semantics = [#tpu.dimension_semantics<parallel>], iteration_bounds = array<i64: 4>, scalar_prefetch = 0 : i64, scratch_operands = 0 : i64, tpu.core_type = #tpu.core_type<tc>, window_params = [{transform_indices = @transform_0, window_bounds = array<i64: 256, 32>}, {pipeline_mode = #tpu.pipeline_mode<synchronous>, transform_indices = @transform_1, window_bounds = array<i64: 9, 32>}, {pipeline_mode = #tpu.pipeline_mode<synchronous>, transform_indices = @transform_2, window_bounds = array<i64: 9, 1>}, {pipeline_mode = #tpu.pipeline_mode<synchronous>, transform_indices = @transform_3, window_bounds = array<i64: 3, 9>}, {pipeline_mode = #tpu.pipeline_mode<synchronous>, transform_indices = @transform_4, window_bounds = array<i64: 3, 1>}, {pipeline_mode = #tpu.pipeline_mode<synchronous>, transform_indices = @transform_5, window_bounds = array<i64: 1, 3>}, {pipeline_mode = #tpu.pipeline_mode<synchronous>, transform_indices = @transform_6, window_bounds = array<i64: 1, 1>}, {transform_indices = @transform_7, window_bounds = array<i64: 1, 256>}]} {
    %c0 = arith.constant 0 : index
    %c0_0 = arith.constant 0 : index
    %0 = vector.load %arg1[%c0, %c0_0] : memref<256x32xf32, #tpu.memory_space<vmem>>, vector<256x32xf32>
    %1 = math.tanh %0 : vector<256x32xf32>
    %c0_1 = arith.constant 0 : index
    %c0_2 = arith.constant 0 : index
    %2 = vector.load %arg2[%c0_1, %c0_2] : memref<9x32xf32, #tpu.memory_space<vmem>>, vector<9x32xf32>
    %3 = tpu.transpose %1, [1, 0] : vector<256x32xf32> -> vector<32x256xf32>
    %cst = arith.constant dense<0.000000e+00> : vector<9x256xf32>
    %4 = tpu.matmul %2, %3, %cst {dimension_numbers = #tpu.dot_dimension_numbers<[1], [0], [0], [1], [0, 0, 1, 1], [], []>} : vector<9x32xf32>, vector<32x256xf32>, vector<9x256xf32> -> vector<9x256xf32>
    %c0_3 = arith.constant 0 : index
    %c0_4 = arith.constant 0 : index
    %5 = vector.load %arg3[%c0_3, %c0_4] : memref<9x1xf32, #tpu.memory_space<vmem>>, vector<9x1xf32>
    %6 = vector.broadcast %5 : vector<9x1xf32> to vector<9x256xf32>
    %7 = arith.addf %4, %6 : vector<9x256xf32>
    %8 = math.tanh %7 : vector<9x256xf32>
    %c0_5 = arith.constant 0 : index
    %c0_6 = arith.constant 0 : index
    %9 = vector.load %arg4[%c0_5, %c0_6] : memref<3x9xf32, #tpu.memory_space<vmem>>, vector<3x9xf32>
    %cst_7 = arith.constant dense<0.000000e+00> : vector<3x256xf32>
    %10 = tpu.matmul %9, %8, %cst_7 {dimension_numbers = #tpu.dot_dimension_numbers<[1], [0], [0], [1], [0, 0, 1, 1], [], []>} : vector<3x9xf32>, vector<9x256xf32>, vector<3x256xf32> -> vector<3x256xf32>
    %c0_8 = arith.constant 0 : index
    %c0_9 = arith.constant 0 : index
    %11 = vector.load %arg5[%c0_8, %c0_9] : memref<3x1xf32, #tpu.memory_space<vmem>>, vector<3x1xf32>
    %12 = vector.broadcast %11 : vector<3x1xf32> to vector<3x256xf32>
    %13 = arith.addf %10, %12 : vector<3x256xf32>
    %14 = math.tanh %13 : vector<3x256xf32>
    %c0_10 = arith.constant 0 : index
    %c0_11 = arith.constant 0 : index
    %15 = vector.load %arg6[%c0_10, %c0_11] : memref<1x3xf32, #tpu.memory_space<vmem>>, vector<1x3xf32>
    %16 = vector.extract_strided_slice %15 {offsets = [0, 0], sizes = [1, 1], strides = [1, 1]} : vector<1x3xf32> to vector<1x1xf32>
    %17 = vector.extract_strided_slice %14 {offsets = [0, 0], sizes = [1, 256], strides = [1, 1]} : vector<3x256xf32> to vector<1x256xf32>
    %18 = vector.broadcast %16 : vector<1x1xf32> to vector<1x256xf32>
    %19 = arith.mulf %18, %17 : vector<1x256xf32>
    %20 = vector.extract_strided_slice %15 {offsets = [0, 1], sizes = [1, 1], strides = [1, 1]} : vector<1x3xf32> to vector<1x1xf32>
    %21 = vector.extract_strided_slice %14 {offsets = [1, 0], sizes = [1, 256], strides = [1, 1]} : vector<3x256xf32> to vector<1x256xf32>
    %22 = vector.broadcast %20 : vector<1x1xf32> to vector<1x256xf32>
    %23 = arith.mulf %22, %21 : vector<1x256xf32>
    %24 = arith.addf %19, %23 : vector<1x256xf32>
    %25 = vector.extract_strided_slice %15 {offsets = [0, 2], sizes = [1, 1], strides = [1, 1]} : vector<1x3xf32> to vector<1x1xf32>
    %26 = vector.extract_strided_slice %14 {offsets = [2, 0], sizes = [1, 256], strides = [1, 1]} : vector<3x256xf32> to vector<1x256xf32>
    %27 = vector.broadcast %25 : vector<1x1xf32> to vector<1x256xf32>
    %28 = arith.mulf %27, %26 : vector<1x256xf32>
    %29 = arith.addf %24, %28 : vector<1x256xf32>
    %c0_12 = arith.constant 0 : index
    %c0_13 = arith.constant 0 : index
    %30 = vector.load %arg7[%c0_12, %c0_13] : memref<1x1xf32, #tpu.memory_space<vmem>>, vector<1x1xf32>
    %31 = vector.broadcast %30 : vector<1x1xf32> to vector<1x256xf32>
    %32 = arith.addf %29, %31 : vector<1x256xf32>
    %c0_14 = arith.constant 0 : index
    %c0_15 = arith.constant 0 : index
    %33 = vector.load %arg8[%c0_14, %c0_15] : memref<1x256xf32, #tpu.memory_space<vmem>>, vector<1x256xf32>
    tpu.vector_store %arg8[%c0_14, %c0_15], %32 {strides = array<i32>} : memref<1x256xf32, #tpu.memory_space<vmem>>, vector<1x256xf32>,
    return
  }
  func.func @transform_0(%arg0: i32) -> (i32, i32) {
    %c0_i32 = arith.constant 0 : i32
    %c0_i32_0 = arith.constant 0 : i32
    return %arg0, %c0_i32 : i32, i32
  }
  func.func @transform_1(%arg0: i32) -> (i32, i32) {
    %c0_i32 = arith.constant 0 : i32
    %c0_i32_0 = arith.constant 0 : i32
    %c0_i32_1 = arith.constant 0 : i32
    return %c0_i32, %c0_i32_0 : i32, i32
  }
  func.func @transform_2(%arg0: i32) -> (i32, i32) {
    %c0_i32 = arith.constant 0 : i32
    %c0_i32_0 = arith.constant 0 : i32
    %c0_i32_1 = arith.constant 0 : i32
    return %c0_i32, %c0_i32_0 : i32, i32
  }
  func.func @transform_3(%arg0: i32) -> (i32, i32) {
    %c0_i32 = arith.constant 0 : i32
    %c0_i32_0 = arith.constant 0 : i32
    %c0_i32_1 = arith.constant 0 : i32
    return %c0_i32, %c0_i32_0 : i32, i32
  }
  func.func @transform_4(%arg0: i32) -> (i32, i32) {
    %c0_i32 = arith.constant 0 : i32
    %c0_i32_0 = arith.constant 0 : i32
    %c0_i32_1 = arith.constant 0 : i32
    return %c0_i32, %c0_i32_0 : i32, i32
  }
  func.func @transform_5(%arg0: i32) -> (i32, i32) {
    %c0_i32 = arith.constant 0 : i32
    %c0_i32_0 = arith.constant 0 : i32
    %c0_i32_1 = arith.constant 0 : i32
    return %c0_i32, %c0_i32_0 : i32, i32
  }
  func.func @transform_6(%arg0: i32) -> (i32, i32) {
    %c0_i32 = arith.constant 0 : i32
    %c0_i32_0 = arith.constant 0 : i32
    %c0_i32_1 = arith.constant 0 : i32
    return %c0_i32, %c0_i32_0 : i32, i32
  }
  func.func @transform_7(%arg0: i32) -> (i32, i32) {
    %c0_i32 = arith.constant 0 : i32
    %c0_i32_0 = arith.constant 0 : i32
    return %c0_i32, %arg0 : i32, i32
  }
}

</mosaic_0001>

<bundles_post_ra>
// kernel: tpu_custom_call.1
= control target key start
LH: loop header
LB: loop body
LE: loop exit
PB: predicated region body
PF: predicated region fallthrough
CT: control target
= control target key end

     0   :  { %s1376_s0 = inlined_call_operand.vmem [shape: f32[1024,32], index: 0, kind: input, shape index: {}]   ;;  %s1377_s1 = inlined_call_operand.vmem [shape: f32[9,32], index: 1, kind: input, shape index: {}]   ;;  %s1378_s2 = inlined_call_operand.vmem [shape: f32[9,1], index: 2, kind: input, shape index: {}]   ;;  %s1379_s3 = inlined_call_operand.vmem [shape: f32[3,9], index: 3, kind: input, shape index: {}]   ;;  %s1380_s4 = inlined_call_operand.vmem [shape: f32[3,1], index: 4, kind: input, shape index: {}]   ;;  %s1381_s5 = inlined_call_operand.vmem [shape: f32[1,3], index: 5, kind: input, shape index: {}]   ;;  %s1382_s6 = inlined_call_operand.<no memory space> [shape: f32[1,1], index: 6, kind: input, shape index: {}]   ;;  %s1383_s7 = inlined_call_operand.hbm [shape: f32[1,1024], index: 7, kind: output, shape index: {}]  }
   0x1   :  { %v12_v0 = vstv %s1382_s6 }
   0x2   :  { %13 = vst [vmem:[#allocation2] sm:$0x1] %v12_v0 }
   0x3   :  { %14 = vsyncpa [#allocation4], 0 }
   0x4   :  { %16 = vsyncpa [#allocation4 + $0x1], 0  ;;  %s1171_s26 = smov 0   ;;  %s1173_s27 = smov 0  }
   0x5   :  { %s1175_s28 = smov 0   ;;  %s1177_s29 = smov 0  }
   0x6 LB: > { %s791_s6 = sadd.s32 4294967295, %s1119_s29   ;;  %s792_s30 = sadd.s32 4294967294, %s1119_s29   ;;  %s1119_s29 = sphi %s1177_s29, %s1391_s29   ;;  %s1115_s28 = sphi %s1175_s28, %s1390_s28   ;;  %s1111_s27 = sphi %s1173_s27, %s1389_s27   ;;  %s1107_s26 = sphi %s1171_s26, %s1388_s26  }
   0x7   : > { %s1194_s8 = sadd.s32 1, %s1119_s29   ;;  %s181_s9 = sadd.s32 1, %s1115_s28 }
   0x8   : > { %s178_s10 = ssub.s32 %s1119_s29, %s1194_s8  ;;  %p191_p0 = scmp.ne.s32.totalorder %s1115_s28, %s1111_s27 }
   0x9   : > { %p179_p1 = scmp.eq.s32.totalorder %s178_s10, 0  ;;  %p192_p2 = scmp.eq.s32.totalorder %s791_s6, 3 }
   0xa   : > { %p197_p3 = scmp.ne.s32.totalorder %s1111_s27, %s1107_s26  ;;  %p198_p4 = scmp.eq.s32.totalorder %s792_s30, 3 }
   0xb   : > { %s1204_s11 = scalar_select %p179_p1, %s1115_s28, %s181_s9  }
   0xc   : > { %p1206_p5 = por %p192_p2, %p191_p0  ;;  %p1210_p6 = por %p198_p4, %p197_p3 }
   0xd   : > { %p795_p7 = scmp.ge.s32.totalorder %s1119_s29, 1  ;;  %p243_p8 = scmp.lt.s32.totalorder %s1119_s29, 5 }
   0xf   : > { %p244_p9 = pnand %p795_p7, %p243_p8 }
  0x10   : > { %s1216_s14 = sshll.u32 (!%p244_p9), %s791_s6, 5  ;;  %vm360_vm0 = vcmask (!%p244_p9), 261120   ;;  %v1221_v1 = vld [vmem:[%s1377_s1] sm:$0xff] (!%p244_p9)  ;;  %v1121_v2 = vmov (!%p244_p9), 0   ;;  %v349_v4 = vld [vmem:[%s1378_s2 + $0x8] sm:$0x1] (!%p244_p9) }
  0x11   : > { %247 = sbr.rel (%p244_p9) target bundleno = 600 (0x258), region = 48  ;;  %p276_p10 = scmp.lt.s32.totalorder (!%p244_p9), %s1216_s14, 127  ;;  %874 = vmatprep.mubr.msk.f32.mxu0 (!%p244_p9), %vm360_vm0, %v1221_v1  ;;  %977 = vset.pattern.permute.xlu0 (!%p244_p9), %v1121_v2  ;;  %v348_v3 = vld [vmem:[%s1378_s2] sm:$0xff] (!%p244_p9)  ;;  %vm1257_vm1 = vmpackc.low (!%p244_p9), %vm360_vm0, %vm360_vm0  ;;  %v1123_v20 = vmov (!%p244_p9), 1   ;;  %vm555_vm2 = vcmask (!%p244_p9), 1040384   ;;  %vm1125_vm3 = vmmov (!%p244_p9), 1  }
  0x12   : > { %352 = vperm.xlu0 (!%p244_p9), %977, %v348_v3   ;;  %978 = vset.pattern.permute.xlu1 (!%p244_p9), %v1121_v2  ;;  %v1241_v5 = vld [vmem:[%s1381_s5] sm:$0x1] (!%p244_p9)  ;;  %vm927_vm4 = vmpackc.low (!%p244_p9), %vm555_vm2, %vm1125_vm3  ;;  %vm551_vm5 = vcmask (!%p244_p9), 72704   ;;  %s1127_s9 = smov (!%p244_p9), [#allocation3]  }
  0x13   : > { %v683_v13 = vld [vmem:[#allocation2] sm:$0x1] (!%p244_p9)  ;;  %s1061_s10 = sshll.u32 (!%p244_p9), %s1127_s9, 4  ;;  %s1062_s10 = int_to_ptr.vmem [resolvable:$false] %s1061_s10 }
  0x14   : > { %s1063_s15 = scalar_lea.vmem (!%p244_p9), %s1062_s10, 64 }
  0x16   : > { %357 = vperm.xlu0 (!%p244_p9), %977, %v349_v4  }
  0x18   : > { %s277_s19 = scalar_select %p276_p10, %s1216_s14, 127 }
  0x1a   : > { %s798_s22 = sshll.u32 %s277_s19, 3  ;;  %638 = vperm.xlu0 %977, %v1241_v5   ;;  %s272_s19 = sand.u32 1, %s1111_s27  }
  0x1b   : > { %s1236_s25 = scalar_lea.vmem %s1376_s0, %s798_s22  ;;  %s796_s20 = sshll.u32 %s272_s19, 1 }
  0x1c   : > { %v298_v6 = vld [vmem:[%s1236_s25 + $0x80] sm:$0xff]  ;;  %v299_v7 = vld [vmem:[%s1236_s25 + $0x88] sm:$0xff]  ;;  %v300_v10 = vld [vmem:[%s1236_s25 + $0x90] sm:$0xff]  ;;  %s274_s21 = scalar_lea.vmem [#allocation3], %s796_s20  ;;  %s719_s6 = scalar_lea.sflag [#allocation4], %s272_s19 }
  0x1d   : > { %v282_v8 = vld [vmem:[%s1236_s25] sm:$0xff]  ;;  %981 = vtanh.f32 %v298_v6  ;;  %v283_v9 = vld [vmem:[%s1236_s25 + $0x8] sm:$0xff]  ;;  %v301_v11 = vld [vmem:[%s1236_s25 + $0x98] sm:$0xff]  ;;  %s733_s22 = sshll.u32 %s274_s21, 4  ;;  %s1336_s22 = int_to_ptr.vmem [resolvable:$true] %s733_s22 }
  0x1e   : > { %983 = vtanh.f32 %v299_v7  ;;  %v284_v12 = vld [vmem:[%s1236_s25 + $0x10] sm:$0xff]  ;;  %v285_v14 = vld [vmem:[%s1236_s25 + $0x18] sm:$0xff]  ;;  %v302_v15 = vld [vmem:[%s1236_s25 + $0xa0] sm:$0xff]  ;;  %686 = vperm.xlu0 %977, %v683_v13   ;;  %s1057_s30 = scalar_lea.vmem %s1336_s22, 32  ;;  %p1064_p0 = scmp.lt.s32.totalorder %s1336_s22, %s1062_s10 }
  0x1f   : > { %985 = vtanh.f32 %v282_v8  ;;  %v303_v16 = vld [vmem:[%s1236_s25 + $0xa8] sm:$0xff]  ;;  %v286_v18 = vld [vmem:[%s1236_s25 + $0x20] sm:$0xff]  ;;  %v304_v24 = vld [vmem:[%s1236_s25 + $0xb0] sm:$0xff]  ;;  %p1058_p11 = scmp.ne.s32.totalorder %s1336_s22, %s1057_s30  ;;  %p1065_p1 = scmp.lt.s32.totalorder %s1063_s15, %s1057_s30 }
  0x20   : > { %987 = vtanh.f32 %v283_v9  ;;  %v287_v21 = vld [vmem:[%s1236_s25 + $0x28] sm:$0xff]  ;;  %v305_v26 = vld [vmem:[%s1236_s25 + $0xb8] sm:$0xff]  ;;  %v288_v34 = vld [vmem:[%s1236_s25 + $0x30] sm:$0xff] }
  0x21   : > { %989 = vtanh.f32 %v300_v10  ;;  %v289_v36 = vld [vmem:[%s1236_s25 + $0x38] sm:$0xff]  ;;  %v306_v38 = vld [vmem:[%s1236_s25 + $0xc0] sm:$0xff]  ;;  %v307_v40 = vld [vmem:[%s1236_s25 + $0xc8] sm:$0xff]  ;;  %p1059_p12 = pnand %p1058_p11, %p1206_p5  ;;  %p1066_p2 = por %p1065_p1, %p1064_p0 }
  0x22   : > { %991 = vtanh.f32 %v301_v11  ;;  %v290_v45 = vld [vmem:[%s1236_s25 + $0x40] sm:$0xff]  ;;  %v291_v46 = vld [vmem:[%s1236_s25 + $0x48] sm:$0xff]  ;;  %v308_v48 = vld [vmem:[%s1236_s25 + $0xd0] sm:$0xff] }
  0x23   : > { %993 = vtanh.f32 %v284_v12  ;;  %v309_v50 = vld [vmem:[%s1236_s25 + $0xd8] sm:$0xff]  ;;  %v292_v55 = vld [vmem:[%s1236_s25 + $0x50] sm:$0xff]  ;;  %v310_v58 = vld [vmem:[%s1236_s25 + $0xe0] sm:$0xff]  ;;  %p1060_p13 = pneg %p1059_p12 }
  0x24   : > { %995 = vtanh.f32 %v285_v14  ;;  %v293_v56 = vld [vmem:[%s1236_s25 + $0x58] sm:$0xff]  ;;  %v311_v60 = vld [vmem:[%s1236_s25 + $0xe8] sm:$0xff]  ;;  %v294_v2 = vld [vmem:[%s1236_s25 + $0x60] sm:$0xff] }
  0x25   : > { %997 = vtanh.f32 %v302_v15  ;;  %v295_v3 = vld [vmem:[%s1236_s25 + $0x68] sm:$0xff]  ;;  %v312_v6 = vld [vmem:[%s1236_s25 + $0xf0] sm:$0xff]  ;;  %v313_v8 = vld [vmem:[%s1236_s25 + $0xf8] sm:$0xff]  ;;  %p1067_p3 = pnand %p1066_p2, %p1060_p13 }
  0x26   : > { %999 = vtanh.f32 %v303_v16  ;;  %v296_v13 = vld [vmem:[%s1236_s25 + $0x70] sm:$0xff]  ;;  %v297_v15 = vld [vmem:[%s1236_s25 + $0x78] sm:$0xff]  ;;  %s1334_s25 = scalar_lea.hbm %s1383_s7, %s1216_s14 }
  0x27   : > { %v982_v17 = vpop.eup %981  ;;  %1001 = vtanh.f32 %v286_v18 }
  0x28   : > { %v984_v19 = vpop.eup %983  ;;  %1003 = vtanh.f32 %v287_v21 }
  0x29   : > { %v986_v22 = vpop.eup %985  ;;  %v878_v23 = vpack.c.bf16 %v984_v19, %v982_v17  ;;  %1005 = vtanh.f32 %v304_v24 }
  0x2a   : > { %v988_v25 = vpop.eup %987  ;;  %1007 = vtanh.f32 %v305_v26 }
  0x2b   : > { %v990_v27 = vpop.eup %989  ;;  %880 = vmatprep.subr.msk.bf16.mxu0 %vm1257_vm1, %v878_v23  ;;  %v881_v28 = vpack.c.bf16 %v988_v25, %v986_v22  ;;  %1009 = vtanh.f32 %v288_v34 }
  0x2c   : > { %v992_v29 = vpop.eup %991  ;;  %1011 = vtanh.f32 %v289_v36 }
  0x2d   : > { %v994_v30 = vpop.eup %993  ;;  %883 = vmatpush3.bf16.xpose.msk.msra.mxu0 %vm1257_vm1, %v881_v28  ;;  %v884_v31 = vpack.c.bf16 %v992_v29, %v990_v27  ;;  %1013 = vtanh.f32 %v306_v38  ;;  %v347_v27 = vld [vmem:[%s1377_s1 + $0x8] sm:$0x1]  ;;  %v1122_v28 = vmov 0.0   ;;  %v545_v29 = vld [vmem:[%s1380_s4] sm:$0x7] }
  0x2e   : > { %v996_v32 = vpop.eup %995  ;;  %1015 = vtanh.f32 %v307_v40  ;;  %626 = vmatprep.mubr.f32.mxu1 %v1122_v28  ;;  %548 = vperm.xlu1 %978, %v545_v29  }
  0x2f   : > { %v998_v33 = vpop.eup %997  ;;  %886 = vmatprep.subr.msk.bf16.mxu0 %vm1257_vm1, %v884_v31  ;;  %v887_v37 = vpack.c.bf16 %v996_v32, %v994_v30  ;;  %1017 = vtanh.f32 %v290_v45  ;;  %v1124_v30 = vmov 2   ;;  %v544_v45 = vld [vmem:[%s1379_s3] sm:$0x7] }
  0x30   : > { %v1000_v35 = vpop.eup %999  ;;  %1019 = vtanh.f32 %v291_v46 }
  0x31   : > { %v890_v39 = vpack.c.bf16 %v1000_v35, %v998_v33  ;;  %v1002_v41 = vpop.eup %1001  ;;  %1021 = vtanh.f32 %v308_v48 }
  0x32   : > { %v1004_v42 = vpop.eup %1003  ;;  %1023 = vtanh.f32 %v309_v50  ;;  %979 = vset.pattern.permute.xlu1 %v1123_v20 }
  0x33   : > { %v1006_v43 = vpop.eup %1005  ;;  %v893_v47 = vpack.c.bf16 %v1004_v42, %v1002_v41  ;;  %1025 = vtanh.f32 %v292_v55  ;;  %648 = vperm.xlu1 %979, %v1241_v5  }
  0x34   : > { %v1008_v44 = vpop.eup %1007  ;;  %1027 = vtanh.f32 %v293_v56 }
  0x35   : > { %889 = vmatpush3.bf16.xpose.msk.msra.mxu0 %vm1257_vm1, %v887_v37  ;;  %v896_v49 = vpack.c.bf16 %v1008_v44, %v1006_v43  ;;  %v1010_v51 = vpop.eup %1009  ;;  %1029 = vtanh.f32 %v310_v58 }
  0x36   : > { %892 = vmatprep.subr.msk.bf16.mxu0 %vm1257_vm1, %v890_v39  ;;  %v1012_v52 = vpop.eup %1011  ;;  %1031 = vtanh.f32 %v311_v60 }
  0x37   : > { %v1014_v53 = vpop.eup %1013  ;;  %v899_v57 = vpack.c.bf16 %v1012_v52, %v1010_v51  ;;  %1033 = vtanh.f32 %v294_v2  ;;  %980 = vset.pattern.permute.xlu1 %v1124_v30 }
  0x38   : > { %v1016_v54 = vpop.eup %1015  ;;  %1035 = vtanh.f32 %v295_v3  ;;  %666 = vperm.xlu1 %980, %v1241_v5   ;;  %v1126_v3 = vmov 1966171168  }
  0x39   : > { %v902_v59 = vpack.c.bf16 %v1016_v54, %v1014_v53  ;;  %v1018_v61 = vpop.eup %1017  ;;  %1037 = vtanh.f32 %v312_v6 }
  0x3a   : > { %v1020_v62 = vpop.eup %1019  ;;  %1039 = vtanh.f32 %v313_v8 }
  0x3b   : > { %v1022_v63 = vpop.eup %1021  ;;  %v905_v4 = vpack.c.bf16 %v1020_v62, %v1018_v61  ;;  %1041 = vtanh.f32 %v296_v13 }
  0x3c   : > { %v1024_v0 = vpop.eup %1023  ;;  %1043 = vtanh.f32 %v297_v15 }
  0x3d   : > { %895 = vmatpush3.bf16.xpose.msk.msra.mxu0 %vm1257_vm1, %v893_v47  ;;  %v908_v7 = vpack.c.bf16 %v1024_v0, %v1022_v63  ;;  %v1026_v9 = vpop.eup %1025  ;;  %v641_v47 = vlaneseq }
  0x3e   : > { %898 = vmatprep.subr.msk.bf16.mxu0 %vm1257_vm1, %v896_v49  ;;  %v1028_v10 = vpop.eup %1027 }
  0x3f   : > { %v1030_v11 = vpop.eup %1029  ;;  %v911_v14 = vpack.c.bf16 %v1028_v10, %v1026_v9  ;;  %v642_v53 = vshrl.u32 %v641_v47, 7  ;;  %vm715_vm6 = vcmp.lt.s32.totalorder %v641_v47, 256 }
  0x40   : > { %v1032_v12 = vpop.eup %1031 }
  0x41   : > { %v914_v16 = vpack.c.bf16 %v1032_v12, %v1030_v11  ;;  %v1034_v17 = vpop.eup %1033  ;;  %v643_v55 = vsub.s32 0, %v642_v53 }
  0x42   : > { %v1036_v18 = vpop.eup %1035 }
  0x43   : > { %v1038_v19 = vpop.eup %1037  ;;  %v917_v22 = vpack.c.bf16 %v1036_v18, %v1034_v17 }
  0x44   : > { %v1040_v21 = vpop.eup %1039 }
  0x45   : > { %901 = vmatpush3.bf16.xpose.msk.msra.mxu0 %vm1257_vm1, %v899_v57  ;;  %v920_v23 = vpack.c.bf16 %v1040_v21, %v1038_v19  ;;  %v1042_v24 = vpop.eup %1041 }
  0x46   : > { %904 = vmatprep.subr.msk.bf16.mxu0 %vm1257_vm1, %v902_v59  ;;  %v1044_v25 = vpop.eup %1043 }
  0x47   : > { %v923_v26 = vpack.c.bf16 %v1044_v25, %v1042_v24 }
  0x4d   : > { %907 = vmatpush3.bf16.xpose.msk.msra.mxu0 %vm1257_vm1, %v905_v4  ;;  %v699_v4 = vunpack.c.l.s4 %v1126_v3 }
  0x4e   : > { %910 = vmatprep.subr.msk.bf16.mxu0 %vm1257_vm1, %v908_v7 }
  0x4f   : > { %v700_v15 = vunpack.c.0.s8 %v699_v4 }
  0x55   : > { %913 = vmatpush3.bf16.xpose.msk.msra.mxu0 %vm1257_vm1, %v911_v14 }
  0x56   : > { %916 = vmatprep.subr.msk.bf16.mxu0 %vm1257_vm1, %v914_v16 }
  0x5d   : > { %919 = vmatpush3.bf16.xpose.msk.msra.mxu0 %vm1257_vm1, %v917_v22  ;;  %v703_v22 = vsub.s32 %v700_v15, %v642_v53 }
  0x5e   : > { %922 = vmatprep.subr.msk.bf16.mxu0 %vm1257_vm1, %v920_v23 }
  0x65   : > { %925 = vmatpush3.bf16.xpose.msk.msra.mxu0 %vm1257_vm1, %v923_v26 }
  0x6c   : > { %875 = vmatmul.mubr.msk.f32.vlgmr.msra.gmra.mrb[0].mxu0 %vm360_vm0, %v1221_v1 }
  0x6d   : > { %876 = vmatprep.mubr.msk.f32.mxu0 %vm360_vm0, %v347_v27 }
  0x70   : > { %877 = vmatmul.mubr.msk.f32.gmra.mrb[2].mxu0 %vm360_vm0, %v347_v27 }
  0x91   : > { %v353_v1 = vpop.permute.xlu0 %352 }
  0x95   : > { %v358_v35 = vpop.permute.xlu0 %357 }
  0x99   : > { %v639_v57 = vpop.permute.xlu0 %638 }
  0x9a   : > { %v644_v61 = vrot.slane %v639_v57, %v643_v55 }
  0x9d   : > { %v687_v8 = vpop.permute.xlu0 %686 }
  0x9e   : > { %v692_v16 = vrot.slane %v687_v8, %v643_v55 }
  0xad   : > { %v549_v46 = vpop.permute.xlu1 %548 }
  0xb2   : > { %v649_v51 = vpop.permute.xlu1 %648 }
  0xb3   : > { %v654_v58 = vrot.slane %v649_v51, %v643_v55 }
  0xb7   : > { %v667_v54 = vpop.permute.xlu1 %666 }
  0xb8   : > { %v672_v56 = vrot.slane %v667_v54, %v643_v55 }
 0x13f   : > { %v529_v31 = vpop.f32.mrb[0].mxu0 }
 0x140   : > { %v530_v32 = vadd.f32 %v529_v31, %v353_v1  ;;  %v531_v33 = vpop.f32.mrb[1].mxu0 }
 0x141   : > { %v532_v34 = vadd.f32 %v531_v33, %v353_v1 }
 0x142   : > { %1045 = vtanh.f32 %v530_v32 }
 0x143   : > { %v535_v36 = vpop.f32.mrb[2].mxu0  ;;  %1047 = vtanh.f32 %v532_v34 }
 0x144   : > { %v536_v37 = vadd.f32 %v535_v36, %v358_v35  ;;  %v537_v38 = vpop.f32.mrb[3].mxu0 }
 0x145   : > { %v538_v39 = vadd.f32 %v537_v38, %v358_v35 }
 0x146   : > { %1049 = vtanh.f32 %v536_v37 }
 0x147   : > { %1051 = vtanh.f32 %v538_v39 }
 0x14c   : > { %v1046_v40 = vpop.eup %1045 }
 0x14d   : > { %v1048_v41 = vpop.eup %1047 }
 0x150   : > { %v1050_v42 = vpop.eup %1049 }
 0x151   : > { %v1052_v43 = vpop.eup %1051  ;;  %v929_v5 = vpack.c.bf16 %v1050_v42, %v1046_v40 }
 0x152   : > { %v926_v44 = vpack.c.bf16 %v1052_v43, %v1048_v41 }
 0x154   : > { %928 = vmatprep.subr.msk.bf16.mxu1 %vm927_vm4, %v926_v44 }
 0x155   : > { %931 = vmatpush1.bf16.msk.msra.mxu1 %vm927_vm4, %v929_v5 }
 0x158   : > { %835 = vmatmul.mubr.msk.f32.vlgmr.msra.gmra.mrb[0].mxu1 %vm551_vm5, %v544_v45 }
 0x22b   : > { %v628_v48 = vpop.f32.mrb[0].mxu1 }
 0x22c   : > { %v629_v49 = vadd.f32 %v628_v48, %v549_v46  ;;  %v630_v50 = vpop.f32.mrb[1].mxu1 }
 0x22d   : > { %v631_v52 = vadd.f32 %v630_v50, %v549_v46 }
 0x22e   : > { %1053 = vtanh.f32 %v629_v49 }
 0x22f   : > { %1055 = vtanh.f32 %v631_v52 }
 0x238   : > { %v1054_v59 = vpop.eup %1053 }
 0x239   : > { %v1056_v60 = vpop.eup %1055  ;;  %v655_v62 = vmul.f32 %v1054_v59, %v654_v58  ;;  %v673_v63 = vmul.f32 %v1054_v59, %v672_v56  ;;  %v645_v6 = vmul.f32 %v1054_v59, %v644_v61 }
 0x23a   : > { %v656_v0 = vmul.f32 %v1056_v60, %v654_v58  ;;  %v674_v2 = vmul.f32 %v1056_v60, %v672_v56  ;;  %v646_v9 = vmul.f32 %v1056_v60, %v644_v61 }
 0x23b   : > { %v659_v7 = vrot.slane %v655_v62, 1  ;;  %v677_v12 = vrot.slane %v673_v63, 2 }
 0x23c   : > { %v660_v10 = vrot.slane %v656_v0, 1  ;;  %v678_v14 = vrot.slane %v674_v2, 2 }
 0x23d   : > { %v663_v11 = vadd.f32 %v659_v7, %v645_v6 }
 0x23e   : > { %v664_v13 = vadd.f32 %v660_v10, %v646_v9 }
 0x23f   : > { %v681_v17 = vadd.f32 %v677_v12, %v663_v11 }
 0x240   : > { %v682_v18 = vadd.f32 %v678_v14, %v664_v13 }
 0x241   : > { %v693_v19 = vadd.f32 %v692_v16, %v681_v17 }
 0x242   : > { %v694_v21 = vadd.f32 %v692_v16, %v682_v18 }
 0x244   : > { %v697_v23 = vcombine.low %v693_v19, %v694_v21 }
 0x246   : > { %v704_v24 = vrot.slane %v697_v23, %v703_v22 }
 0x248   : > { %v711_v25 = vrot.slane %v704_v24, %v703_v22 }
 0x24a   : > { %717 = vst.msk [vmem:[%s274_s21] sm:$0x3] %vm715_vm6, %v711_v25 }
 0x24b   : > { %1070 = shalt.err (!%p1067_p3)
}
 0x24c   : > { %s1071_s14 = scalar_lea.hbm %s1334_s25, 32  ;;  %s1075_s18 = scalar_lea.hbm %s1383_s7, 128 }
 0x24d   : > { %p1072_p4 = scmp.ne.s32.totalorder %s1334_s25, %s1071_s14  ;;  %p1076_p9 = scmp.lt.u32.totalorder %s1334_s25, %s1383_s7 }
 0x24e   : > { %p1077_p10 = scmp.lt.u32.totalorder %s1075_s18, %s1071_s14  ;;  %p1079_p12 = scmp.lt.u32.totalorder %s1071_s14, %s1334_s25 }
 0x24f   : > { %p1073_p7 = pnand %p1072_p4, %p1206_p5 }
 0x250   : > { %p1078_p11 = por %p1077_p10, %p1076_p9 }
 0x251   : > { %p1074_p8 = pneg %p1073_p7 }
 0x252   : > { %p1080_p13 = por %p1079_p12, %p1078_p11 }
 0x254   : > { %p1081_p0 = pnand %p1080_p13, %p1074_p8 }
 0x256   : > { %1084 = shalt.err (!%p1081_p0)
}
 0x257   : > { %932 = dma.vmem_to_hbm [thread:$0]  (%p1206_p5), %s1336_s22, 32, %s1334_s25, %s719_s6  }
 0x258 PF: > { %p938_p1 = scmp.ge.s32.totalorder %s1119_s29, 2  ;;  %s745_s21 = sand.u32 1, %s1107_s26  }
 0x259   : > { %s746_s23 = scalar_lea.sflag [#allocation4], %s745_s21 }
 0x25a   : > { %p935_p2 = pnand %p938_p1, %p1210_p6 }
 0x25c   : > { %1102 = dma.done.wait (!%p935_p2), %s746_s23, 32  }
 0x25d   : > { %1104 = vsyncadd (!%p935_p2), %s746_s23, 4294967264  ;;  %p19_p3 = scmp.ge.s32.totalorder %s1194_s8, 6   ;;  %s1388_s26 = smov %s1111_s27 }
 0x25e   : > { %s1389_s27 = smov %s1115_s28  ;;  %s1390_s28 = smov %s1204_s11 }
 0x25f   : > { %s1391_s29 = smov %s1194_s8  ;;  %21 = sbr.rel (!%p19_p3) target bundleno = 6 (0x6), region = 83 }
 0x266   :  { %751 = vsyncpa [#allocation4], 1 }
 0x267   :  { %753 = vsyncpa [#allocation4 + $0x1], 1 }

</bundles_post_ra>
